<compile_context>
chip_gen: v6e
topology: v6e:2x2x1
jax: 0.10.0
libtpu: 0.0.40
codegen_flags: <defaults>
</compile_context>

<pallas_src>
import jax
import jax.numpy as jnp
from jax.experimental import pallas as pl
from jax.experimental.pallas import tpu as pltpu


def _attention_kernel(x_ref, w1_ref, b1_ref, w2_ref, b2_ref, o_ref):
    # x_ref : (TB, S, H) f32   TB batch elements per grid step
    # w1_ref: (H, H)     bf16  first linear weight (applied as x @ w1)
    # b1_ref: (1, H)     f32
    # w2_ref: (1, H)     f32   second linear weight as a row
    # b2_ref: (1,)       f32   scalar bias, in SMEM
    # o_ref : (TB, H)    f32
    tb, s, h_dim = x_ref.shape

    x = x_ref[...]                                                    # (TB, S, H) f32

    # ---- Linear1 + tanh: one big MXU matmul on the flattened (TB*S, H) slab,
    #      bf16 operands / f32 accumulation; tanh + bias stay f32 (v5e-safe).
    x2 = x.reshape(tb * s, h_dim).astype(jnp.bfloat16)
    h = jnp.dot(x2, w1_ref[...], preferred_element_type=jnp.float32)  # (TB*S, H) f32
    h = jnp.tanh(h + b1_ref[...])

    # ---- Linear2 (output width 1): keep it off the MXU — lane multiply + XLU
    #      cross-lane reduce instead of an N=1 matmul.
    h3 = h.reshape(tb, s, h_dim)
    scores = jnp.sum(h3 * w2_ref[...], axis=-1) + b2_ref[0]           # (TB, S) f32

    # ---- softmax over the sequence axis (per batch row), f32 stats.
    m = jnp.max(scores, axis=-1, keepdims=True)                       # (TB, 1)
    p = jnp.exp(scores - m)                                           # (TB, S)
    inv = pl.reciprocal(jnp.sum(p, axis=-1, keepdims=True),
                        approx=True)                                  # (TB, 1), EUP

    # ---- weighted reduction: batched (1,S)x(S,H) MXU matmul on the UNnormalized
    #      probs, scaled by 1/sum afterwards. x and p kept f32 for accuracy.
    o = jnp.einsum("bqs,bsh->bqh", p.reshape(tb, 1, s), x,
                   preferred_element_type=jnp.float32)                # (TB, 1, H)
    o_ref[...] = (o.reshape(tb, h_dim) * inv).astype(o_ref.dtype)


def _pick_block_b(B, S, H):
    # Size the batch tile against a conservative double-buffered-x VMEM budget
    # (fits v7x's 32 MiB scoped default with plenty of headroom).
    vmem_budget = 8 * 1024 * 1024                       # bytes for x double-buffer
    rows = max(1, vmem_budget // (2 * S * H * 4))       # f32 x, 2 buffers
    if rows >= B:
        return B                                        # single step; block == full dim
    return max(8, min(256, (rows // 8) * 8))            # sublane-aligned batch tile


def attention_layer(hidden_states, w1, b1, w2, b2, *, block_b=None):
    """hidden_states: (B, S, H) f32. Returns (B, H) f32."""
    B, S, H = hidden_states.shape
    tb = _pick_block_b(B, S, H) if block_b is None else block_b

    # Pad the batch to a multiple of the tile; padded rows are sliced off.
    b_pad = (-B) % tb
    x = hidden_states
    if b_pad:
        x = jnp.pad(x, ((0, b_pad), (0, 0), (0, 0)))
    Bp = B + b_pad

    w1_bf16 = w1.astype(jnp.bfloat16)             # MXU operand; halves weight DMA/VMEM
    b1_2d = b1.reshape(1, H).astype(jnp.float32)
    w2_row = w2.reshape(1, H).astype(jnp.float32)
    b2_1d = b2.reshape(1).astype(jnp.float32)

    out = pl.pallas_call(
        _attention_kernel,
        out_shape=jax.ShapeDtypeStruct((Bp, H), jnp.float32),
        grid_spec=pltpu.PrefetchScalarGridSpec(
            num_scalar_prefetch=0,
            grid=(Bp // tb,),
            in_specs=[
                pl.BlockSpec((tb, S, H), lambda b: (b, 0, 0)),      # hidden_states
                pl.BlockSpec((H, H), lambda b: (0, 0)),             # w1 (bf16)
                pl.BlockSpec((1, H), lambda b: (0, 0)),             # b1
                pl.BlockSpec((1, H), lambda b: (0, 0)),             # w2 row
                pl.BlockSpec(memory_space=pltpu.MemorySpace.SMEM),  # b2 scalar
            ],
            out_specs=pl.BlockSpec((tb, H), lambda b: (b, 0)),
        ),
        compiler_params=pltpu.CompilerParams(
            dimension_semantics=("parallel",),      # megacore / 2-TC v7x sharding
            vmem_limit_bytes=32 * 1024 * 1024,
        ),
    )(x, w1_bf16, b1_2d, w2_row, b2_1d)

    return out[:B] if b_pad else out


def _reference(hidden_states, w1, b1, w2, b2):
    # Pure-JAX reference mirroring the PyTorch forward (f32 throughout).
    scores = jnp.tanh(hidden_states @ w1 + b1) @ w2.reshape(-1, 1) + b2  # (B, S, 1)
    scores = scores[..., 0]                                              # (B, S)
    attn = jax.nn.softmax(scores, axis=1)                                # (B, S)
    return jnp.einsum("bs,bsh->bh", attn, hidden_states)                 # (B, H)


if __name__ == "__main__":
    key = jax.random.PRNGKey(0)
    k_x, k_w1, k_b1, k_w2, k_b2, k_x2 = jax.random.split(key, 6)

    # --- primary small-shape check (matches the module's implied shapes) ---
    B, S, H = 2, 8, 32
    hidden_states = jax.random.normal(k_x, (B, S, H), dtype=jnp.float32)

    bound1 = 1.0 / (H ** 0.5)
    w1 = jax.random.uniform(k_w1, (H, H), jnp.float32, -bound1, bound1)
    b1 = jax.random.uniform(k_b1, (H,), jnp.float32, -bound1, bound1)
    w2 = jax.random.uniform(k_w2, (H,), jnp.float32, -bound1, bound1)
    b2 = jax.random.uniform(k_b2, (1,), jnp.float32, -bound1, bound1)

    out = attention_layer(hidden_states, w1, b1, w2, b2)
    out = jax.block_until_ready(out)
    ref = _reference(hidden_states, w1, b1, w2, b2)
    assert out.shape == (B, H)
    # bf16 MXU operands on the first matmul -> relaxed tolerance vs f32 reference.
    assert jnp.allclose(out, ref, atol=3e-2, rtol=3e-2), "mismatch vs reference"

    # --- second check: exercise multi-step batch tiling + padding path ---
    B2 = 20
    hs2 = jax.random.normal(k_x2, (B2, S, H), dtype=jnp.float32)
    out2 = attention_layer(hs2, w1, b1, w2, b2, block_b=8)   # Bp=24, grid=(3,)
    out2 = jax.block_until_ready(out2)
    ref2 = _reference(hs2, w1, b1, w2, b2)
    assert out2.shape == (B2, H)
    assert jnp.allclose(out2, ref2, atol=3e-2, rtol=3e-2), "mismatch vs reference (tiled)"

    print("KERNEL_OK")
</pallas_src>

<mosaic_0001>
module attributes {stable_mosaic.version = 11 : i64} {
  func.func @_attention_kernel(%arg0: i32, %arg1: memref<2x8x32xf32, #tpu.memory_space<vmem>>, %arg2: memref<32x32xbf16, #tpu.memory_space<vmem>>, %arg3: memref<1x32xf32, #tpu.memory_space<vmem>>, %arg4: memref<1x32xf32, #tpu.memory_space<vmem>>, %arg5: memref<1xf32, #tpu.memory_space<smem>>, %arg6: memref<2x32xf32, #tpu.memory_space<vmem>>) attributes {dimension_semantics = [#tpu.dimension_semantics<parallel>], iteration_bounds = array<i64: 1>, scalar_prefetch = 0 : i64, scratch_operands = 0 : i64, tpu.core_type = #tpu.core_type<tc>, window_params = [{transform_indices = @transform_0, window_bounds = array<i64: 2, 8, 32>}, {pipeline_mode = #tpu.pipeline_mode<synchronous>, transform_indices = @transform_1, window_bounds = array<i64: 32, 32>}, {pipeline_mode = #tpu.pipeline_mode<synchronous>, transform_indices = @transform_2, window_bounds = array<i64: 1, 32>}, {pipeline_mode = #tpu.pipeline_mode<synchronous>, transform_indices = @transform_3, window_bounds = array<i64: 1, 32>}, {transform_indices = @transform_4, window_bounds = array<i64: 1>}, {transform_indices = @transform_5, window_bounds = array<i64: 2, 32>}]} {
    %c0 = arith.constant 0 : index
    %c0_0 = arith.constant 0 : index
    %c0_1 = arith.constant 0 : index
    %0 = vector.load %arg1[%c0, %c0_0, %c0_1] : memref<2x8x32xf32, #tpu.memory_space<vmem>>, vector<2x8x32xf32>
    %1 = vector.shape_cast %0 : vector<2x8x32xf32> to vector<16x32xf32>
    %2 = arith.truncf %1 : vector<16x32xf32> to vector<16x32xbf16>
    %c0_2 = arith.constant 0 : index
    %c0_3 = arith.constant 0 : index
    %3 = vector.load %arg2[%c0_2, %c0_3] : memref<32x32xbf16, #tpu.memory_space<vmem>>, vector<32x32xbf16>
    %cst = arith.constant dense<0.000000e+00> : vector<16x32xf32>
    %4 = tpu.matmul %2, %3, %cst {dimension_numbers = #tpu.dot_dimension_numbers<[1], [0], [0], [1], [0, 0, 1, 1], [], []>} : vector<16x32xbf16>, vector<32x32xbf16>, vector<16x32xf32> -> vector<16x32xf32>
    %c0_4 = arith.constant 0 : index
    %c0_5 = arith.constant 0 : index
    %5 = vector.load %arg3[%c0_4, %c0_5] : memref<1x32xf32, #tpu.memory_space<vmem>>, vector<1x32xf32>
    %6 = vector.broadcast %5 : vector<1x32xf32> to vector<16x32xf32>
    %7 = arith.addf %4, %6 : vector<16x32xf32>
    %8 = math.tanh %7 : vector<16x32xf32>
    %9 = vector.shape_cast %8 : vector<16x32xf32> to vector<2x8x32xf32>
    %c0_6 = arith.constant 0 : index
    %c0_7 = arith.constant 0 : index
    %10 = vector.load %arg4[%c0_6, %c0_7] : memref<1x32xf32, #tpu.memory_space<vmem>>, vector<1x32xf32>
    %11 = vector.shape_cast %10 : vector<1x32xf32> to vector<1x1x32xf32>
    %12 = vector.broadcast %11 : vector<1x1x32xf32> to vector<2x8x32xf32>
    %13 = arith.mulf %9, %12 : vector<2x8x32xf32>
    %cst_8 = arith.constant dense<0.000000e+00> : vector<2x8xf32>
    %14 = vector.multi_reduction <add>, %13, %cst_8 [2] : vector<2x8x32xf32> to vector<2x8xf32>
    %c0_9 = arith.constant 0 : index
    %15 = memref.load %arg5[%c0_9] : memref<1xf32, #tpu.memory_space<smem>>
    %16 = vector.broadcast %15 : f32 to vector<2x8xf32>
    %17 = arith.addf %14, %16 : vector<2x8xf32>
    %cst_10 = arith.constant dense<0xFF800000> : vector<2xf32>
    %18 = vector.multi_reduction <maximumf>, %17, %cst_10 [1] : vector<2x8xf32> to vector<2xf32>
    %19 = vector.shape_cast %18 : vector<2xf32> to vector<2x1xf32>
    %20 = vector.broadcast %19 : vector<2x1xf32> to vector<2x8xf32>
    %21 = arith.subf %17, %20 : vector<2x8xf32>
    %22 = math.exp %21 : vector<2x8xf32>
    %cst_11 = arith.constant dense<0.000000e+00> : vector<2xf32>
    %23 = vector.multi_reduction <add>, %22, %cst_11 [1] : vector<2x8xf32> to vector<2xf32>
    %24 = vector.shape_cast %23 : vector<2xf32> to vector<2x1xf32>
    %25 = tpu.reciprocal %24 {approx = true} : vector<2x1xf32> -> vector<2x1xf32>
    %26 = vector.shape_cast %22 : vector<2x8xf32> to vector<2x1x8xf32>
    "tpu.trace_start"() <{level = 10 : i32, message = "bqs,bsh->bqh"}> : () -> ()
    %cst_12 = arith.constant dense<0.000000e+00> : vector<2x1x32xf32>
    %27 = tpu.matmul %26, %0, %cst_12 {dimension_numbers = #tpu.dot_dimension_numbers<[2], [1], [1], [2], [0, 0, 0, 1, 1, 2], [0], [0]>} : vector<2x1x8xf32>, vector<2x8x32xf32>, vector<2x1x32xf32> -> vector<2x1x32xf32>
    "tpu.trace_stop"() : () -> ()
    %28 = vector.shape_cast %27 : vector<2x1x32xf32> to vector<2x32xf32>
    %29 = vector.broadcast %25 : vector<2x1xf32> to vector<2x32xf32>
    %30 = arith.mulf %28, %29 : vector<2x32xf32>
    %c0_13 = arith.constant 0 : index
    %c0_14 = arith.constant 0 : index
    %31 = vector.load %arg6[%c0_13, %c0_14] : memref<2x32xf32, #tpu.memory_space<vmem>>, vector<2x32xf32>
    tpu.vector_store %arg6[%c0_13, %c0_14], %30 {strides = array<i32>} : memref<2x32xf32, #tpu.memory_space<vmem>>, vector<2x32xf32>,
    return
  }
  func.func @transform_0(%arg0: i32) -> (i32, i32, i32) {
    %c0_i32 = arith.constant 0 : i32
    %c0_i32_0 = arith.constant 0 : i32
    %c0_i32_1 = arith.constant 0 : i32
    return %arg0, %c0_i32, %c0_i32_0 : i32, i32, i32
  }
  func.func @transform_1(%arg0: i32) -> (i32, i32) {
    %c0_i32 = arith.constant 0 : i32
    %c0_i32_0 = arith.constant 0 : i32
    %c0_i32_1 = arith.constant 0 : i32
    return %c0_i32, %c0_i32_0 : i32, i32
  }
  func.func @transform_2(%arg0: i32) -> (i32, i32) {
    %c0_i32 = arith.constant 0 : i32
    %c0_i32_0 = arith.constant 0 : i32
    %c0_i32_1 = arith.constant 0 : i32
    return %c0_i32, %c0_i32_0 : i32, i32
  }
  func.func @transform_3(%arg0: i32) -> (i32, i32) {
    %c0_i32 = arith.constant 0 : i32
    %c0_i32_0 = arith.constant 0 : i32
    %c0_i32_1 = arith.constant 0 : i32
    return %c0_i32, %c0_i32_0 : i32, i32
  }
  func.func @transform_4(%arg0: i32) -> i32 {
    %c0_i32 = arith.constant 0 : i32
    %c0_i32_0 = arith.constant 0 : i32
    return %c0_i32 : i32
  }
  func.func @transform_5(%arg0: i32) -> (i32, i32) {
    %c0_i32 = arith.constant 0 : i32
    %c0_i32_0 = arith.constant 0 : i32
    return %arg0, %c0_i32 : i32, i32
  }
}

</mosaic_0001>

<bundles_post_ra>
// kernel: tpu_custom_call.1
= control target key start
LH: loop header
LB: loop body
LE: loop exit
PB: predicated region body
PF: predicated region fallthrough
CT: control target
= control target key end

     0   :  { %11 = vsyncpa [#allocation4], 0  ;;  %s577_s0 = inlined_call_operand.hbm [shape: f32[2,8,32], index: 0, kind: input, shape index: {}]   ;;  %s578_s1 = inlined_call_operand.hbm [shape: bf16[32,32], index: 1, kind: input, shape index: {}]   ;;  %s579_s2 = inlined_call_operand.vmem [shape: f32[1,32], index: 2, kind: input, shape index: {}]   ;;  %s580_s3 = inlined_call_operand.vmem [shape: f32[1,32], index: 3, kind: input, shape index: {}]   ;;  %s581_s4 = inlined_call_operand.<no memory space> [shape: f32[1], index: 4, kind: input, shape index: {}]   ;;  %s582_s5 = inlined_call_operand.hbm [shape: f32[2,32], index: 5, kind: output, shape index: {}]  }
   0x1   :  { %12 = vsyncpa [#allocation7], 0 }
   0x2   :  { %13 = vsyncpa [#allocation5], 0  ;;  %s497_s18 = smov [#allocation3]  }
   0x3   :  { %s19_s19 = sshll.u32 %s497_s18, 4  ;;  %s20_s19 = int_to_ptr.vmem [resolvable:$true] %s19_s19 }
   0x4   :  { %s439_s20 = scalar_lea.vmem %s20_s19, 256  ;;  %p444_p1 = scmp.lt.s32.totalorder %s20_s19, %s20_s19 }
   0x5   :  { %p440_p0 = scmp.ne.s32.totalorder %s20_s19, %s439_s20  ;;  %p445_p2 = scmp.lt.s32.totalorder %s439_s20, %s439_s20 }
   0x7   :  { %p446_p3 = por %p445_p2, %p444_p1 }
   0x9   :  { %p447_p4 = pnand %p446_p3, %p440_p0 }
   0xb   :  { %450 = shalt.err (!%p447_p4)
}
   0xc   :  { %s498_s21 = smov 128   ;;  %s499_s22 = smov 8  }
   0xd   :  { %25 = dma.hbm_to_vmem [thread:$0]  %s577_s0, 256, %s20_s19, [#allocation4], %s498_s21, %s498_s21, %s499_s22  }
   0xe   :  { %s500_s25 = smov [#allocation6]  }
   0xf   :  { %s31_s26 = sshll.u32 %s500_s25, 4  ;;  %s32_s26 = int_to_ptr.vmem [resolvable:$true] %s31_s26 }
  0x10   :  { %s459_s27 = scalar_lea.vmem %s32_s26, 256  ;;  %p464_p6 = scmp.lt.s32.totalorder %s32_s26, %s32_s26 }
  0x11   :  { %p460_p5 = scmp.ne.s32.totalorder %s32_s26, %s459_s27  ;;  %p465_p7 = scmp.lt.s32.totalorder %s459_s27, %s459_s27 }
  0x13   :  { %p466_p8 = por %p465_p7, %p464_p6 }
  0x15   :  { %p467_p9 = pnand %p466_p8, %p460_p5 }
  0x17   :  { %470 = shalt.err (!%p467_p9)
}
  0x18   :  { %s501_s28 = smov 64   ;;  %s502_s29 = smov 4  }
  0x19   :  { %37 = dma.hbm_to_vmem [thread:$0]  %s578_s1, 256, %s32_s26, [#allocation7], %s501_s28, %s501_s28, %s502_s29  }
  0x1a   :  { %491 = dma.done.wait [#allocation4], 256  }
  0x1b   :  { %492 = vsyncadd [#allocation4], 4294967040 }
  0x1c   :  { %493 = dma.done.wait [#allocation7], 256  }
  0x1d   :  { %494 = vsyncadd [#allocation7], 4294967040  ;;  %v503_v0 = vmov 0.0   ;;  %vm504_vm0 = vmmov 0   ;;  %v419_v1 = vld [vmem:[#allocation6 + $0x8] sm:$0xff]   ;;  %v420_v2 = vld [vmem:[#allocation6] sm:$0xff]   ;;  %v145_v20 = vlaneseq  ;;  %v140_v23 = vstv %s581_s4 }
  0x1e   :  { %389 = vmatprep.subr.bf16.mxu0 %v503_v0  ;;  %393 = vmatprep.mubr.msk.bf16.mxu0 %vm504_vm0, %v503_v0  ;;  %v51_v3 = vld [vmem:[#allocation3] sm:$0xff]  ;;  %v549_v4 = vld [vmem:[#allocation3 + $0x8] sm:$0xff]  ;;  %vm77_vm1 = vcmask 261120   ;;  %vm155_vm2 = vcmask 1041409   ;;  %vm158_vm3 = vcmask 58368   ;;  %v505_v33 = vmov 0  }
  0x1f   :  { %397 = vmatprep.subr.mxu1 %v503_v0  ;;  %399 = vmatprep.mubr.msk.f32.mxu1 %vm504_vm0, %v503_v0  ;;  %v53_v5 = vpack.c.bf16 %v549_v4, %v51_v3  ;;  %v375_v6 = vld [vmem:[%s579_s2] ss:$0 sm:$0xff]  ;;  %v146_v21 = vand.u32 127, %v145_v20  ;;  %v148_v22 = vshrl.u32 %v145_v20, 7  ;;  %vm201_vm4 = vcmask 64512  }
  0x20   :  { %390 = vmatpush3.bf16.msra.mxu0 %v419_v1  ;;  %398 = vmatpush3.msra.mxu1 %v51_v3  ;;  %v379_v13 = vld [vmem:[%s580_s3] ss:$0 sm:$0xff]  ;;  %s506_s3 = smov [#allocation8]   ;;  %vm357_vm5 = vcmask 254976  }
  0x21   :  { %391 = vmatprep.subr.bf16.mxu0 %v503_v0  ;;  %402 = vmatprep.subr.mxu1 %v503_v0  ;;  %v149_v25 = vsub.s32 %v146_v21, %v148_v22  ;;  %v165_v34 = vsub.s32 0, %v148_v22  ;;  %v169_v35 = vsub.s32 1, %v148_v22  ;;  %s365_s4 = sshll.u32 %s506_s3, 4  ;;  %s366_s4 = int_to_ptr.vmem [resolvable:$true] %s365_s4 }
  0x22   :  { %418 = vset.pattern.permute.xlu0 %v505_v33  ;;  %417 = vset.pattern.permute.xlu1 %v505_v33  ;;  %s471_s10 = scalar_lea.vmem %s366_s4, 32  ;;  %p476_p11 = scmp.lt.s32.totalorder %s366_s4, %s366_s4 }
  0x23   :  { %p472_p10 = scmp.ne.s32.totalorder %s366_s4, %s471_s10  ;;  %p477_p12 = scmp.lt.s32.totalorder %s471_s10, %s471_s10 }
  0x24   :  { %392 = vmatpush3.bf16.msra.mxu0 %v420_v2 }
  0x25   :  { %p478_p13 = por %p477_p12, %p476_p11 }
  0x27   :  { %394 = vmatmul.mubr.msk.bf16.vlgmr.msra.gmra.mxu0 %vm77_vm1, %v53_v5  ;;  %p479_p0 = pnand %p478_p13, %p472_p10 }
  0xe7   :  { %v115_v7 = vpop.f32.mrf.mxu0 }
  0xe8   :  { %v116_v8 = vadd.f32 %v375_v6, %v115_v7 }
  0xe9   :  { %v395_v9 = vpop.f32.mrf.mxu0 }
  0xea   :  { %421 = vtanh.f32 %v116_v8 }
  0xeb   :  { %v118_v10 = vpop.f32.mrf.mxu0 }
  0xec   :  { %v119_v11 = vadd.f32 %v375_v6, %v118_v10 }
  0xed   :  { %v396_v12 = vpop.f32.mrf.mxu0 }
  0xee   :  { %423 = vtanh.f32 %v119_v11 }
  0xf7   :  { %v422_v14 = vpop.eup %421 }
  0xf8   :  { %v131_v15 = vmul.f32 %v422_v14, %v379_v13 }
  0xfa   :  { %v133_v16 = vsel %vm77_vm1, %v131_v15, 0.0 }
  0xfb   :  { %v424_v17 = vpop.eup %423  ;;  %134 = vadd.xlane.f32.xlu0 %v133_v16 }
  0xfc   :  { %v132_v18 = vmul.f32 %v424_v17, %v379_v13 }
  0xfe   :  { %v136_v19 = vsel %vm77_vm1, %v132_v18, 0.0 }
  0xff   :  { %137 = vadd.xlane.f32.xlu0 %v136_v19 }
 0x184   :  { %v135_v24 = vpop.xlane.xlu0 %134 }
 0x185   :  { %v141_v26 = vadd.f32 %v140_v23, %v135_v24 }
 0x187   :  { %v150_v29 = vrot.slane %v141_v26, %v149_v25 }
 0x188   :  { %v138_v27 = vpop.xlane.xlu0 %137 }
 0x189   :  { %v142_v28 = vadd.f32 %v140_v23, %v138_v27 }
 0x18b   :  { %v154_v30 = vrot.slane %v142_v28, %v149_v25 }
 0x18d   :  { %v156_v31 = vsel %vm155_vm2, %v154_v30, %v150_v29 }
 0x18e   :  { %v159_v32 = vsel %vm158_vm3, %v156_v31, -inf }
 0x18f   :  { %160 = vmax.xlane.f32.xlu1 %v159_v32 }
 0x218   :  { %v161_v36 = vpop.xlane.xlu1 %160 }
 0x219   :  { %v166_v37 = vrot.slane %v161_v36, %v165_v34  ;;  %v170_v38 = vrot.slane %v161_v36, %v169_v35 }
 0x21b   :  { %v173_v39 = vsub.f32 %v141_v26, %v166_v37  ;;  %v174_v40 = vsub.f32 %v142_v28, %v170_v38 }
 0x21d   :  { %v175_v41 = vmul.f32 1.442695, %v173_v39  ;;  %v177_v42 = vmul.f32 1.442695, %v174_v40 }
 0x21f   :  { %425 = vpow2.f32 %v175_v41 }
 0x220   :  { %427 = vpow2.f32 %v177_v42 }
 0x22c   :  { %v426_v43 = vpop.eup %425 }
 0x22d   :  { %v428_v44 = vpop.eup %427  ;;  %182 = vperm.xlu1 %417, %v426_v43  }
 0x22e   :  { %185 = vperm.xlu0 %418, %v428_v44  }
 0x2a8   :  { %v183_v45 = vpop.permute.xlu1 %182 }
 0x2a9   :  { %v186_v46 = vpop.permute.xlu0 %185  ;;  %v190_v47 = vrot.slane %v183_v45, %v149_v25 }
 0x2aa   :  { %v194_v48 = vrot.slane %v186_v46, %v149_v25 }
 0x2ab   :  { %400 = vmatmul.mubr.msk.f32.vlgmr.msra.gmra.mxu1 %vm201_vm4, %v190_v47 }
 0x2ac   :  { %403 = vmatpush3.msra.mxu1 %v549_v4  ;;  %v195_v49 = vsel %vm155_vm2, %v194_v48, %v190_v47  ;;  %404 = vmatprep.mubr.msk.f32.mxu1 %vm504_vm0, %v503_v0 }
 0x2ad   :  { %v197_v50 = vsel %vm158_vm3, %v195_v49, 0.0 }
 0x2ae   :  { %198 = vadd.xlane.f32.xlu1 %v197_v50 }
 0x2af   :  { %405 = vmatmul.mubr.msk.f32.vlgmr.msra.gmra.mxu1 %vm201_vm4, %v194_v48 }
 0x337   :  { %v199_v51 = vpop.xlane.xlu1 %198 }
 0x338   :  { %429 = vrcp.f32 %v199_v51 }
 0x345   :  { %v430_v52 = vpop.eup %429 }
 0x346   :  { %v347_v55 = vrot.slane %v430_v52, 1 }
 0x36b   :  { %v270_v53 = vpop.f32.mrf.mxu1 }
 0x36c   :  { %v350_v59 = vmul.f32 %v430_v52, %v270_v53 }
 0x36d   :  { %v401_v54 = vpop.f32.mrf.mxu1 }
 0x36f   :  { %v342_v56 = vpop.f32.mrf.mxu1 }
 0x370   :  { %v351_v57 = vmul.f32 %v347_v55, %v342_v56 }
 0x371   :  { %v406_v58 = vpop.f32.mrf.mxu1 }
 0x372   :  { %v354_v60 = vrot.slane %v351_v57, 7 }
 0x374   :  { %v355_v61 = vsel %vm155_vm2, %v354_v60, %v350_v59 }
 0x375   :  { %358 = vst.msk [vmem:[#allocation8] sm:$0x3] %vm357_vm5, %v355_v61 }
 0x376   :  { %482 = shalt.err (!%p479_p0)
}
 0x377   :  { %368 = dma.vmem_to_hbm [thread:$0]  %s366_s4, 32, %s582_s5, [#allocation5]  }
 0x378   :  { %495 = dma.done.wait [#allocation5], 32  }
 0x379   :  { %496 = vsyncadd [#allocation5], 4294967264 }
 0x37a   :  { %372 = vsyncpa [#allocation4], 1 }
 0x37b   :  { %373 = vsyncpa [#allocation7], 1 }
 0x37c   :  { %374 = vsyncpa [#allocation5], 1 }

</bundles_post_ra>
